<compile_context>
chip_gen: v7x
topology: tpu7x:2x2x1
jax: 0.10.0
libtpu: 0.0.40
codegen_flags: <defaults>
</compile_context>

<pallas_src>
import jax
import jax.numpy as jnp
from jax.experimental import pallas as pl
from jax.experimental.pallas import tpu as pltpu

_BN_EPS = 1e-5


def _round_up(x, m):
    return ((x + m - 1) // m) * m


# ----------------------------- fused Pallas kernel -------------------------- #

def _make_fused_kernel(num_residual, embedding_dim, layer_dims, out_width):
    """Build the fused Generator kernel.

    Ref layout (inputs, then output, then scratch):
      x                       (B, embedding_dim)          f32
      w_0 .. w_{L-1}          (cur_dim_k, o_k)            bf16  (rows in [x, out_0, ...] order)
      w_final                 (total_dim, out_width)      bf16  (zero-padded columns)
      vec                     (2L+1, vec_width)           f32   rows: g0,b0,g1,b1,...,final_bias
      out                     (B, out_width)              f32
      cat_scratch             (B, total_dim)              f32   VMEM concat buffer
    """
    dims = tuple(layer_dims)

    def kernel(*refs):
        refs = list(refs)
        cat_ref = refs.pop()                       # VMEM concat scratch (last)
        out_ref = refs.pop()                       # output ref
        x_ref = refs[0]
        w_refs = refs[1:2 + num_residual]          # L residual weights + final weight
        vec_ref = refs[1 + num_residual + 1 - 1 + 1]  # = refs[2 + num_residual]
        vec_ref = refs[2 + num_residual]

        batch = x_ref.shape[0]
        inv_b = 1.0 / batch

        # Stage x into its concat slot.
        cat_ref[:, 0:embedding_dim] = x_ref[...]

        cur = embedding_dim
        for k in range(num_residual):
            o = dims[k]
            # One big-K matmul over the filled prefix of the concat scratch.
            lhs = cat_ref[:, :cur].astype(jnp.bfloat16)
            h = jnp.dot(lhs, w_refs[k][...], preferred_element_type=jnp.float32)
            # (Linear bias intentionally omitted: exactly cancelled by BN mean.)

            gamma = vec_ref[2 * k:2 * k + 1, :o]           # (1, o) f32
            beta = vec_ref[2 * k + 1:2 * k + 2, :o]        # (1, o) f32

            # Two-pass biased batch statistics (PyTorch training-mode BN).
            mean = jnp.sum(h, axis=0, keepdims=True) * inv_b
            c = h - mean
            var = jnp.sum(c * c, axis=0, keepdims=True) * inv_b
            s = gamma * jax.lax.rsqrt(var + _BN_EPS)       # folded BN affine scale
            act = jnp.maximum(c * s + beta, 0.0)           # BN + ReLU, 2 VPU ops + max

            cat_ref[:, cur:cur + o] = act                  # write concat slot
            cur += o

        # Final Linear over the whole concat; output is lane-dense (padded).
        y = jnp.dot(cat_ref[...].astype(jnp.bfloat16), w_refs[num_residual][...],
                    preferred_element_type=jnp.float32)
        y = y + vec_ref[2 * num_residual:2 * num_residual + 1, :out_width]
        out_ref[...] = y

    return kernel


# ------------------------------ JAX wrappers -------------------------------- #

def _reorder_rows(wt, torch_block_sizes):
    """wt: (in_dim, out_dim) with row blocks in torch concat order
    [out_{k-1}, ..., out_0, x]; return rows reordered to [x, out_0, ..., out_{k-1}]."""
    blocks, start = [], 0
    for d in torch_block_sizes:
        blocks.append(wt[start:start + d])
        start += d
    return jnp.concatenate(blocks[::-1], axis=0) if len(blocks) > 1 else blocks[0]


def prepare_fused_params(params, embedding_dim):
    """Pack parameters for the fused kernel:
      * one bf16 (in, out) weight per Linear, rows reordered to concat-scratch order,
      * residual Linear biases dropped (cancelled by training-mode BN),
      * final weight/bias zero-padded to a 128-lane output,
      * all gammas/betas + final bias packed into one lane-dense f32 slab."""
    gen_dims = [p["w"].shape[0] for p in params["residuals"]]
    data_dim = params["final"]["w"].shape[0]
    out_width = _round_up(data_dim, 128)
    vec_width = max(max(gen_dims) if gen_dims else 1, out_width)

    weights = []
    torch_blocks = [embedding_dim]                 # block sizes in torch concat order
    for p in params["residuals"]:
        wt = jnp.transpose(p["w"])                 # (in_features, out_features)
        weights.append(_reorder_rows(wt, torch_blocks).astype(jnp.bfloat16))
        torch_blocks.insert(0, p["w"].shape[0])    # newest activation block goes first

    wtf = _reorder_rows(jnp.transpose(params["final"]["w"]), torch_blocks)
    wtf = jnp.pad(wtf, ((0, 0), (0, out_width - data_dim)))
    weights.append(wtf.astype(jnp.bfloat16))

    rows = 2 * len(gen_dims) + 1
    vec = jnp.zeros((rows, vec_width), jnp.float32)
    for k, p in enumerate(params["residuals"]):
        o = gen_dims[k]
        vec = vec.at[2 * k, :o].set(p["gamma"].reshape(-1))
        vec = vec.at[2 * k + 1, :o].set(p["beta"].reshape(-1))
    vec = vec.at[rows - 1, :data_dim].set(params["final"]["b"].reshape(-1))

    return tuple(weights) + (vec,)


def build_generator_forward(embedding_dim, generator_dim, data_dim):
    generator_dim = tuple(generator_dim)
    num_residual = len(generator_dim)
    out_width = _round_up(data_dim, 128)
    total_dim = embedding_dim + sum(generator_dim)
    kernel = _make_fused_kernel(num_residual, embedding_dim, generator_dim, out_width)
    vmem = pl.BlockSpec(memory_space=pltpu.MemorySpace.VMEM)

    @jax.jit
    def forward(x, fused_params):
        batch = x.shape[0]

        # Advisory cost estimate for XLA's scheduler.
        flops, in_dim = 0, embedding_dim
        for o in generator_dim:
            flops += 2 * batch * in_dim * o + 8 * batch * o
            in_dim += o
        flops += 2 * batch * in_dim * out_width + 2 * batch * out_width
        transcendentals = int(sum(generator_dim))          # one rsqrt per BN feature
        bytes_accessed = x.size * x.dtype.itemsize + batch * out_width * 4
        for a in fused_params:
            bytes_accessed += a.size * a.dtype.itemsize

        out_pad = pl.pallas_call(
            kernel,
            out_shape=jax.ShapeDtypeStruct((batch, out_width), jnp.float32),
            in_specs=[vmem] * (1 + len(fused_params)),
            out_specs=vmem,
            scratch_shapes=[pltpu.VMEM((batch, total_dim), jnp.float32)],
            cost_estimate=pl.CostEstimate(
                flops=int(flops),
                transcendentals=transcendentals,
                bytes_accessed=int(bytes_accessed)),
        )(x, *fused_params)
        return out_pad[:, :data_dim]                        # strip lane padding

    return forward


# ------------------------------ parameters ---------------------------------- #

def init_generator_params(key, embedding_dim, generator_dim, data_dim):
    """Deterministic synthetic parameters matching PyTorch module shapes
    (weights kept in the PyTorch (out_features, in_features) convention)."""
    params = {"residuals": []}
    dim = embedding_dim
    for item in generator_dim:
        key, k_w, k_b = jax.random.split(key, 3)
        bound = 1.0 / jnp.sqrt(dim)
        params["residuals"].append({
            "w": jax.random.uniform(k_w, (item, dim), jnp.float32, -bound, bound),
            "b": jax.random.uniform(k_b, (1, item), jnp.float32, -bound, bound),
            "gamma": jnp.ones((1, item), jnp.float32),
            "beta": jnp.zeros((1, item), jnp.float32),
        })
        dim += item
    key, k_w, k_b = jax.random.split(key, 3)
    bound = 1.0 / jnp.sqrt(dim)
    params["final"] = {
        "w": jax.random.uniform(k_w, (data_dim, dim), jnp.float32, -bound, bound),
        "b": jax.random.uniform(k_b, (1, data_dim), jnp.float32, -bound, bound),
    }
    return params


# ------------------------------- reference ---------------------------------- #

def generator_forward_ref(x, params):
    """Pure-JAX f32 reference mirroring the PyTorch forward (biases included)."""
    h = x
    for p in params["residuals"]:
        lin = h @ p["w"].T + p["b"]
        mean = jnp.mean(lin, axis=0, keepdims=True)
        var = jnp.mean((lin - mean) ** 2, axis=0, keepdims=True)
        bn = (lin - mean) * jax.lax.rsqrt(var + _BN_EPS) * p["gamma"] + p["beta"]
        h = jnp.concatenate([jnp.maximum(bn, 0.0), h], axis=1)
    return h @ params["final"]["w"].T + params["final"]["b"]


# --------------------------------- main -------------------------------------- #

if __name__ == "__main__":
    embedding_dim = 32
    generator_dim = (32, 32)
    data_dim = 16
    batch = 8

    key = jax.random.PRNGKey(0)
    key, k_x = jax.random.split(key)
    x = jax.random.normal(k_x, (batch, embedding_dim), jnp.float32)

    params = init_generator_params(key, embedding_dim, generator_dim, data_dim)
    fused = prepare_fused_params(params, embedding_dim)          # one-time prep
    forward = build_generator_forward(embedding_dim, generator_dim, data_dim)

    out = jax.block_until_ready(forward(x, fused))

    ref = generator_forward_ref(x, params)
    assert out.shape == (batch, data_dim), out.shape
    max_err = float(jnp.max(jnp.abs(out - ref)))
    # bf16 MXU operands with f32 accumulation: tolerance relaxed vs. f32 reference.
    assert jnp.allclose(out, ref, atol=5e-2, rtol=5e-2), max_err

    print("KERNEL_OK")
</pallas_src>

<mosaic_0001>
module attributes {stable_mosaic.version = 11 : i64} {
  func.func @kernel(%arg0: memref<8x32xf32, #tpu.memory_space<vmem>>, %arg1: memref<32x32xbf16, #tpu.memory_space<vmem>>, %arg2: memref<64x32xbf16, #tpu.memory_space<vmem>>, %arg3: memref<96x128xbf16, #tpu.memory_space<vmem>>, %arg4: memref<5x128xf32, #tpu.memory_space<vmem>>, %arg5: memref<8x128xf32, #tpu.memory_space<vmem>>, %arg6: memref<8x96xf32, #tpu.memory_space<vmem>>) attributes {dimension_semantics = [], scalar_prefetch = 0 : i64, scratch_operands = 1 : i64, tpu.core_type = #tpu.core_type<tc>} {
    %c0 = arith.constant 0 : index
    %c0_0 = arith.constant 0 : index
    %0 = vector.load %arg0[%c0, %c0_0] : memref<8x32xf32, #tpu.memory_space<vmem>>, vector<8x32xf32>
    %c0_1 = arith.constant 0 : index
    %c0_2 = arith.constant 0 : index
    %1 = vector.load %arg6[%c0_1, %c0_2] : memref<8x96xf32, #tpu.memory_space<vmem>>, vector<8x32xf32>
    tpu.vector_store %arg6[%c0_1, %c0_2], %0 {strides = array<i32>} : memref<8x96xf32, #tpu.memory_space<vmem>>, vector<8x32xf32>,
    %c0_3 = arith.constant 0 : index
    %c0_4 = arith.constant 0 : index
    %2 = vector.load %arg6[%c0_3, %c0_4] : memref<8x96xf32, #tpu.memory_space<vmem>>, vector<8x32xf32>
    %3 = arith.truncf %2 : vector<8x32xf32> to vector<8x32xbf16>
    %c0_5 = arith.constant 0 : index
    %c0_6 = arith.constant 0 : index
    %4 = vector.load %arg1[%c0_5, %c0_6] : memref<32x32xbf16, #tpu.memory_space<vmem>>, vector<32x32xbf16>
    %cst = arith.constant dense<0.000000e+00> : vector<8x32xf32>
    %5 = tpu.matmul %3, %4, %cst {dimension_numbers = #tpu.dot_dimension_numbers<[1], [0], [0], [1], [0, 0, 1, 1], [], []>} : vector<8x32xbf16>, vector<32x32xbf16>, vector<8x32xf32> -> vector<8x32xf32>
    %c0_7 = arith.constant 0 : index
    %c0_8 = arith.constant 0 : index
    %6 = vector.load %arg4[%c0_7, %c0_8] : memref<5x128xf32, #tpu.memory_space<vmem>>, vector<1x32xf32>
    %c1 = arith.constant 1 : index
    %c0_9 = arith.constant 0 : index
    %7 = vector.load %arg4[%c1, %c0_9] : memref<5x128xf32, #tpu.memory_space<vmem>>, vector<1x32xf32>
    %cst_10 = arith.constant dense<0.000000e+00> : vector<32xf32>
    %8 = vector.multi_reduction <add>, %5, %cst_10 [0] : vector<8x32xf32> to vector<32xf32>
    %9 = vector.shape_cast %8 : vector<32xf32> to vector<1x32xf32>
    %cst_11 = arith.constant 1.250000e-01 : f32
    %10 = vector.broadcast %cst_11 : f32 to vector<1x32xf32>
    %11 = arith.mulf %9, %10 : vector<1x32xf32>
    %12 = vector.broadcast %11 : vector<1x32xf32> to vector<8x32xf32>
    %13 = arith.subf %5, %12 : vector<8x32xf32>
    %14 = arith.mulf %13, %13 : vector<8x32xf32>
    %cst_12 = arith.constant dense<0.000000e+00> : vector<32xf32>
    %15 = vector.multi_reduction <add>, %14, %cst_12 [0] : vector<8x32xf32> to vector<32xf32>
    %16 = vector.shape_cast %15 : vector<32xf32> to vector<1x32xf32>
    %cst_13 = arith.constant 1.250000e-01 : f32
    %17 = vector.broadcast %cst_13 : f32 to vector<1x32xf32>
    %18 = arith.mulf %16, %17 : vector<1x32xf32>
    %cst_14 = arith.constant 9.99999974E-6 : f32
    %19 = vector.broadcast %cst_14 : f32 to vector<1x32xf32>
    %20 = arith.addf %18, %19 : vector<1x32xf32>
    %21 = math.rsqrt %20 : vector<1x32xf32>
    %22 = arith.mulf %6, %21 : vector<1x32xf32>
    %23 = vector.broadcast %22 : vector<1x32xf32> to vector<8x32xf32>
    %24 = arith.mulf %13, %23 : vector<8x32xf32>
    %25 = vector.broadcast %7 : vector<1x32xf32> to vector<8x32xf32>
    %26 = arith.addf %24, %25 : vector<8x32xf32>
    %cst_15 = arith.constant 0.000000e+00 : f32
    %27 = vector.broadcast %cst_15 : f32 to vector<8x32xf32>
    %28 = arith.maximumf %26, %27 : vector<8x32xf32>
    %c0_16 = arith.constant 0 : index
    %c32 = arith.constant 32 : index
    %29 = vector.load %arg6[%c0_16, %c32] : memref<8x96xf32, #tpu.memory_space<vmem>>, vector<8x32xf32>
    tpu.vector_store %arg6[%c0_16, %c32], %28 {strides = array<i32>} : memref<8x96xf32, #tpu.memory_space<vmem>>, vector<8x32xf32>,
    %c0_17 = arith.constant 0 : index
    %c0_18 = arith.constant 0 : index
    %30 = vector.load %arg6[%c0_17, %c0_18] : memref<8x96xf32, #tpu.memory_space<vmem>>, vector<8x64xf32>
    %31 = arith.truncf %30 : vector<8x64xf32> to vector<8x64xbf16>
    %c0_19 = arith.constant 0 : index
    %c0_20 = arith.constant 0 : index
    %32 = vector.load %arg2[%c0_19, %c0_20] : memref<64x32xbf16, #tpu.memory_space<vmem>>, vector<64x32xbf16>
    %cst_21 = arith.constant dense<0.000000e+00> : vector<8x32xf32>
    %33 = tpu.matmul %31, %32, %cst_21 {dimension_numbers = #tpu.dot_dimension_numbers<[1], [0], [0], [1], [0, 0, 1, 1], [], []>} : vector<8x64xbf16>, vector<64x32xbf16>, vector<8x32xf32> -> vector<8x32xf32>
    %c2 = arith.constant 2 : index
    %c0_22 = arith.constant 0 : index
    %34 = vector.load %arg4[%c2, %c0_22] : memref<5x128xf32, #tpu.memory_space<vmem>>, vector<1x32xf32>
    %c3 = arith.constant 3 : index
    %c0_23 = arith.constant 0 : index
    %35 = vector.load %arg4[%c3, %c0_23] : memref<5x128xf32, #tpu.memory_space<vmem>>, vector<1x32xf32>
    %cst_24 = arith.constant dense<0.000000e+00> : vector<32xf32>
    %36 = vector.multi_reduction <add>, %33, %cst_24 [0] : vector<8x32xf32> to vector<32xf32>
    %37 = vector.shape_cast %36 : vector<32xf32> to vector<1x32xf32>
    %cst_25 = arith.constant 1.250000e-01 : f32
    %38 = vector.broadcast %cst_25 : f32 to vector<1x32xf32>
    %39 = arith.mulf %37, %38 : vector<1x32xf32>
    %40 = vector.broadcast %39 : vector<1x32xf32> to vector<8x32xf32>
    %41 = arith.subf %33, %40 : vector<8x32xf32>
    %42 = arith.mulf %41, %41 : vector<8x32xf32>
    %cst_26 = arith.constant dense<0.000000e+00> : vector<32xf32>
    %43 = vector.multi_reduction <add>, %42, %cst_26 [0] : vector<8x32xf32> to vector<32xf32>
    %44 = vector.shape_cast %43 : vector<32xf32> to vector<1x32xf32>
    %cst_27 = arith.constant 1.250000e-01 : f32
    %45 = vector.broadcast %cst_27 : f32 to vector<1x32xf32>
    %46 = arith.mulf %44, %45 : vector<1x32xf32>
    %cst_28 = arith.constant 9.99999974E-6 : f32
    %47 = vector.broadcast %cst_28 : f32 to vector<1x32xf32>
    %48 = arith.addf %46, %47 : vector<1x32xf32>
    %49 = math.rsqrt %48 : vector<1x32xf32>
    %50 = arith.mulf %34, %49 : vector<1x32xf32>
    %51 = vector.broadcast %50 : vector<1x32xf32> to vector<8x32xf32>
    %52 = arith.mulf %41, %51 : vector<8x32xf32>
    %53 = vector.broadcast %35 : vector<1x32xf32> to vector<8x32xf32>
    %54 = arith.addf %52, %53 : vector<8x32xf32>
    %cst_29 = arith.constant 0.000000e+00 : f32
    %55 = vector.broadcast %cst_29 : f32 to vector<8x32xf32>
    %56 = arith.maximumf %54, %55 : vector<8x32xf32>
    %c0_30 = arith.constant 0 : index
    %c64 = arith.constant 64 : index
    %57 = vector.load %arg6[%c0_30, %c64] : memref<8x96xf32, #tpu.memory_space<vmem>>, vector<8x32xf32>
    tpu.vector_store %arg6[%c0_30, %c64], %56 {strides = array<i32>} : memref<8x96xf32, #tpu.memory_space<vmem>>, vector<8x32xf32>,
    %c0_31 = arith.constant 0 : index
    %c0_32 = arith.constant 0 : index
    %58 = vector.load %arg6[%c0_31, %c0_32] : memref<8x96xf32, #tpu.memory_space<vmem>>, vector<8x96xf32>
    %59 = arith.truncf %58 : vector<8x96xf32> to vector<8x96xbf16>
    %c0_33 = arith.constant 0 : index
    %c0_34 = arith.constant 0 : index
    %60 = vector.load %arg3[%c0_33, %c0_34] : memref<96x128xbf16, #tpu.memory_space<vmem>>, vector<96x128xbf16>
    %cst_35 = arith.constant dense<0.000000e+00> : vector<8x128xf32>
    %61 = tpu.matmul %59, %60, %cst_35 {dimension_numbers = #tpu.dot_dimension_numbers<[1], [0], [0], [1], [0, 0, 1, 1], [], []>} : vector<8x96xbf16>, vector<96x128xbf16>, vector<8x128xf32> -> vector<8x128xf32>
    %c4 = arith.constant 4 : index
    %c0_36 = arith.constant 0 : index
    %62 = vector.load %arg4[%c4, %c0_36] : memref<5x128xf32, #tpu.memory_space<vmem>>, vector<1x128xf32>
    %63 = vector.broadcast %62 : vector<1x128xf32> to vector<8x128xf32>
    %64 = arith.addf %61, %63 : vector<8x128xf32>
    %c0_37 = arith.constant 0 : index
    %c0_38 = arith.constant 0 : index
    %65 = vector.load %arg5[%c0_37, %c0_38] : memref<8x128xf32, #tpu.memory_space<vmem>>, vector<8x128xf32>
    tpu.vector_store %arg5[%c0_37, %c0_38], %64 {strides = array<i32>} : memref<8x128xf32, #tpu.memory_space<vmem>>, vector<8x128xf32>,
    return
  }
}

</mosaic_0001>

<bundles_post_ra>
// kernel: forward.1
= control target key start
LH: loop header
LB: loop body
LE: loop exit
PB: predicated region body
PF: predicated region fallthrough
CT: control target
= control target key end

     0   :  { %10 = vsyncpa [#allocation4], 0  ;;  %s692_s0 = inlined_call_operand.vmem [shape: f32[8,32], index: 0, kind: input, shape index: {}]   ;;  %s693_s1 = inlined_call_operand.hbm [shape: bf16[32,32], index: 1, kind: input, shape index: {}]   ;;  %s694_s2 = inlined_call_operand.vmem [shape: bf16[64,32], index: 2, kind: input, shape index: {}]   ;;  %s695_s3 = inlined_call_operand.vmem [shape: bf16[96,128], index: 3, kind: input, shape index: {}]   ;;  %s696_s4 = inlined_call_operand.hbm [shape: f32[5,128], index: 4, kind: input, shape index: {}]   ;;  %s697_s5 = inlined_call_operand.hbm [shape: f32[8,128], index: 5, kind: output, shape index: {}]  }
   0x1   :  { %11 = vsyncpa [#allocation7], 0 }
   0x2   :  { %12 = vsyncpa [#allocation5], 0  ;;  %s551_s18 = smov [#allocation3]   ;;  %s479_s22 = scalar_lea.hbm %s693_s1, 256 }
   0x3   :  { %s20_s19 = sshll.u32 %s551_s18, 4  ;;  %p480_p0 = scmp.ne.s32.totalorder %s693_s1, %s479_s22  ;;  %s21_s19 = int_to_ptr.vmem [resolvable:$true] %s20_s19 }
   0x4   :  { %p483_p1 = scmp.lt.u32.totalorder %s479_s22, %s693_s1 }
   0x6   :  { %p485_p2 = pnand %p483_p1, %p480_p0 }
   0x8   :  { %488 = shalt.err (!%p485_p2)
}
   0x9   :  { %s489_s27 = scalar_lea.vmem %s21_s19, 256  ;;  %p494_p4 = scmp.lt.s32.totalorder %s21_s19, %s21_s19 }
   0xa   :  { %p490_p3 = scmp.ne.s32.totalorder %s21_s19, %s489_s27  ;;  %p495_p5 = scmp.lt.s32.totalorder %s489_s27, %s489_s27 }
   0xc   :  { %p496_p6 = por %p495_p5, %p494_p4 }
   0xe   :  { %p497_p7 = pnand %p496_p6, %p490_p3 }
  0x10   :  { %500 = shalt.err (!%p497_p7)
}
  0x11   :  { %s552_s28 = smov 64   ;;  %s553_s29 = smov 4  }
  0x12   :  { %26 = dma.hbm_to_vmem [thread:$0]  %s693_s1, 256, %s21_s19, [#allocation4], %s552_s28, %s552_s28, %s553_s29  }
  0x13   :  { %s554_s7 = smov [#allocation6]   ;;  %s501_s11 = scalar_lea.hbm %s696_s4, 128 }
  0x14   :  { %s37_s8 = sshll.u32 %s554_s7, 4  ;;  %p502_p8 = scmp.ne.s32.totalorder %s696_s4, %s501_s11  ;;  %s38_s8 = int_to_ptr.vmem [resolvable:$true] %s37_s8 }
  0x15   :  { %p505_p9 = scmp.lt.u32.totalorder %s501_s11, %s696_s4 }
  0x17   :  { %p507_p10 = pnand %p505_p9, %p502_p8 }
  0x19   :  { %510 = shalt.err (!%p507_p10)
}
  0x1a   :  { %s511_s16 = scalar_lea.vmem %s38_s8, 128  ;;  %p516_p12 = scmp.lt.s32.totalorder %s38_s8, %s38_s8 }
  0x1b   :  { %p512_p11 = scmp.ne.s32.totalorder %s38_s8, %s511_s16  ;;  %p517_p13 = scmp.lt.s32.totalorder %s511_s16, %s511_s16 }
  0x1d   :  { %p518_p0 = por %p517_p13, %p516_p12 }
  0x1f   :  { %p519_p1 = pnand %p518_p0, %p512_p11 }
  0x21   :  { %522 = shalt.err (!%p519_p1)
}
  0x22   :  { %40 = dma.hbm_to_vmem [thread:$0]  %s696_s4, 128, %s38_s8, [#allocation7]  }
  0x23   :  { %545 = dma.done.wait [#allocation4], 256  }
  0x24   :  { %546 = vsyncadd [#allocation4], 4294967040 }
  0x25   :  { %547 = dma.done.wait [#allocation7], 128  }
  0x26   :  { %548 = vsyncadd [#allocation7], 4294967168  ;;  %v555_v0 = vmov 0.0   ;;  %vm556_vm0 = vmmov 0   ;;  %v463_v1 = vld [vmem:[#allocation3] sm:$0xff]   ;;  %vm49_vm1 = vcmask 261120   ;;  %v135_v31 = vlaneseq }
  0x27   :  { %419 = vmatprep.subr.bf16.mxu1 %v555_v0  ;;  %423 = vmatprep.mubr.msk.bf16.mxu1 %vm556_vm0, %v555_v0  ;;  %v464_v2 = vld [vmem:[#allocation3 + $0x8] sm:$0xff]   ;;  %v48_v3 = vld [vmem:[%s692_s0] sm:$0xff]  ;;  %v466_v7 = vld [vmem:[%s694_s2 + $0x8] sm:$0xff]   ;;  %s557_s26 = smov 32   ;;  %vm150_vm2 = vcmask 523520   ;;  %vm186_vm3 = vcmask 523264  }
  0x28   :  { %439 = vmatprep.subr.bf16.mxu0 %v555_v0  ;;  %451 = vmatprep.mubr.msk.bf16.mxu0 %vm556_vm0, %v555_v0  ;;  %50 = vst.msk [vmem:[#allocation2] sm:$0xff] %vm49_vm1, %v48_v3  ;;  %v465_v6 = vld [vmem:[%s694_s2] sm:$0xff]   ;;  %v640_v32 = vshrl.u32 %v135_v31, 7  ;;  %v112_v33 = vld [vmem:[#allocation6] sm:$0x1]  ;;  %v467_v34 = vld [vmem:[%s694_s2 + $0x10] sm:$0xff]  }
  0x29   :  { %420 = vmatpush3.bf16.msra.mxu1 %v463_v1  ;;  %v468_v37 = vld [vmem:[%s694_s2 + $0x18] sm:$0xff]   ;;  %v469_v47 = vld [vmem:[%s695_s3] sm:$0xff]   ;;  %v470_v48 = vld [vmem:[%s695_s3 + $0x8] sm:$0xff]   ;;  %vm268_vm4 = vcmask 785920   ;;  %vm325_vm5 = vcmask 785408  }
  0x2a   :  { %421 = vmatprep.subr.bf16.mxu1 %v555_v0  ;;  %v137_v35 = vsub.s32 0, %v640_v32  ;;  %v389_v40 = vld [vmem:[#allocation6 + $0x1] ss:$0 sm:$0xff]  ;;  %440 = vmatpush3.bf16.msra.mxu0 %v469_v47  ;;  %v471_v49 = vld [vmem:[%s695_s3 + $0x10] sm:$0xff]  }
  0x2b   :  { %441 = vmatprep.subr.bf16.mxu0 %v555_v0  ;;  %v472_v50 = vld [vmem:[%s695_s3 + $0x18] sm:$0xff]  }
  0x2d   :  { %422 = vmatpush3.bf16.msra.mxu1 %v464_v2 }
  0x2e   :  { %427 = vmatprep.subr.bf16.mxu1 %v555_v0  ;;  %442 = vmatpush3.bf16.msra.mxu0 %v470_v48 }
  0x2f   :  { %v51_v4 = vld [vmem:[#allocation2] sm:$0xff]  ;;  %443 = vmatprep.subr.bf16.mxu0 %v555_v0 }
  0x30   :  { %v52_v5 = vpack.c.bf16 %v51_v4, %v51_v4 }
  0x32   :  { %424 = vmatmul.mubr.msk.bf16.vlgmr.msra.gmra.mrb[0].mxu1 %vm49_vm1, %v52_v5  ;;  %444 = vmatpush3.bf16.msra.mxu0 %v471_v49 }
  0x33   :  { %435 = vmatprep.mubr.msk.bf16.mxu1 %vm556_vm0, %v555_v0  ;;  %428 = vmatpush3.bf16.msra.mxu1 %v465_v6 }
  0x34   :  { %429 = vmatprep.subr.bf16.mxu1 %v555_v0  ;;  %445 = vmatprep.subr.bf16.mxu0 %v555_v0 }
  0x36   :  { %446 = vmatpush3.bf16.msra.mxu0 %v472_v50 }
  0x37   :  { %430 = vmatpush3.bf16.msra.mxu1 %v466_v7  ;;  %447 = vmatprep.subr.bf16.mxu0 %v555_v0 }
  0x38   :  { %431 = vmatprep.subr.bf16.mxu1 %v555_v0 }
  0x3b   :  { %432 = vmatpush3.bf16.msra.mxu1 %v467_v34 }
  0x3c   :  { %433 = vmatprep.subr.bf16.mxu1 %v555_v0 }
  0x3f   :  { %434 = vmatpush3.bf16.msra.mxu1 %v468_v37 }
 0x105   :  { %v106_v8 = vpop.f32.mrb[0].mxu1 }
 0x106   :  { %v114_v9 = vsel %vm49_vm1, %v106_v8, 0.0  ;;  %v425_v10 = vpop.f32.mrb[1].mxu1 }
 0x107   :  { %v115_v11 = vrot.slane %v114_v9, 4  ;;  %v109_v12 = vpop.f32.mrb[2].mxu1 }
 0x108   :  { %v426_v13 = vpop.f32.mrb[3].mxu1  ;;  %v473_v12 = vld [vmem:[%s695_s3 + $0x20] sm:$0xff]  }
 0x109   :  { %v116_v14 = vadd.f32 %v115_v11, %v114_v9  ;;  %v230_v11 = vld [vmem:[#allocation6 + $0x2] sm:$0x1]  ;;  %448 = vmatpush3.bf16.msra.mxu0 %v473_v12 }
 0x10a   :  { %449 = vmatprep.subr.bf16.mxu0 %v555_v0 }
 0x10b   :  { %v117_v15 = vrot.slane %v116_v14, 2 }
 0x10d   :  { %v118_v16 = vadd.f32 %v117_v15, %v116_v14  ;;  %v474_v14 = vld [vmem:[%s695_s3 + $0x28] sm:$0xff]   ;;  %s558_s3 = smov [#allocation8]  }
 0x10e   :  { %450 = vmatpush3.bf16.msra.mxu0 %v474_v14  ;;  %s376_s14 = sshll.u32 %s558_s3, 4  ;;  %s377_s14 = int_to_ptr.vmem [resolvable:$true] %s376_s14 }
 0x10f   :  { %v119_v17 = vrot.slane %v118_v16, 1  ;;  %s523_s15 = scalar_lea.vmem %s377_s14, 128  ;;  %p528_p3 = scmp.lt.s32.totalorder %s377_s14, %s377_s14 }
 0x110   :  { %p524_p2 = scmp.ne.s32.totalorder %s377_s14, %s523_s15  ;;  %p529_p4 = scmp.lt.s32.totalorder %s523_s15, %s523_s15 }
 0x111   :  { %v120_v18 = vadd.f32 %v119_v17, %v118_v16  ;;  %v395_v17 = vld [vmem:[#allocation6 + $0x3] ss:$0 sm:$0xff] }
 0x112   :  { %p530_p5 = por %p529_p4, %p528_p3 }
 0x113   :  { %v121_v19 = vmul.f32 0.125, %v120_v18 }
 0x114   :  { %p531_p6 = pnand %p530_p5, %p524_p2 }
 0x115   :  { %v122_v20 = vsub.f32 %v106_v8, %v121_v19 }
 0x117   :  { %v123_v21 = vmul.f32 %v122_v20, %v122_v20 }
 0x119   :  { %v124_v22 = vsel %vm49_vm1, %v123_v21, 0.0 }
 0x11a   :  { %v125_v23 = vrot.slane %v124_v22, 4 }
 0x11c   :  { %v126_v24 = vadd.f32 %v125_v23, %v124_v22 }
 0x11e   :  { %v127_v25 = vrot.slane %v126_v24, 2 }
 0x120   :  { %v128_v26 = vadd.f32 %v127_v25, %v126_v24  ;;  %v396_v24 = vld [vmem:[#allocation6 + $0x4] ss:$0 sm:$0xff] }
 0x122   :  { %v129_v27 = vrot.slane %v128_v26, 1 }
 0x124   :  { %v130_v28 = vadd.f32 %v129_v27, %v128_v26 }
 0x126   :  { %v131_v29 = vmul.f32 0.125, %v130_v28 }
 0x128   :  { %v132_v30 = vadd.f32 1e-05, %v131_v29 }
 0x12a   :  { %475 = vrsqrt.f32 %v132_v30 }
 0x134   :  { %v476_v36 = vpop.eup %475 }
 0x135   :  { %v134_v38 = vmul.f32 %v476_v36, %v112_v33 }
 0x137   :  { %v138_v39 = vrot.slane %v134_v38, %v137_v35 }
 0x139   :  { %v139_v41 = vmul.f32 %v138_v39, %v122_v20 }
 0x13b   :  { %v144_v42 = vadd.f32 %v389_v40, %v139_v41 }
 0x13d   :  { %v145_v43 = vmax.f32 %v144_v42, 0.0 }
 0x13f   :  { %147 = vrot.lane.b32.xlu0 %v145_v43, %s557_s26 }
 0x1b1   :  { %v148_v44 = vpop.permute.xlu0 %147 }
 0x1b2   :  { %151 = vst.msk [vmem:[#allocation2] sm:$0xff] %vm150_vm2, %v148_v44 }
 0x1b9   :  { %v152_v45 = vld [vmem:[#allocation2] sm:$0xff] }
 0x1ba   :  { %v153_v46 = vpack.c.bf16 %v152_v45, %v152_v45 }
 0x1bc   :  { %436 = vmatmul.mubr.msk.bf16.vlgmr.msra.gmra.mrb[4].mxu1 %vm186_vm3, %v153_v46 }
 0x28f   :  { %v224_v51 = vpop.f32.mrb[4].mxu1 }
 0x290   :  { %v232_v52 = vsel %vm49_vm1, %v224_v51, 0.0  ;;  %v437_v53 = vpop.f32.mrb[5].mxu1 }
 0x291   :  { %v233_v54 = vrot.slane %v232_v52, 4  ;;  %v227_v55 = vpop.f32.mrb[6].mxu1 }
 0x292   :  { %v438_v56 = vpop.f32.mrb[7].mxu1 }
 0x293   :  { %v234_v57 = vadd.f32 %v233_v54, %v232_v52 }
 0x295   :  { %v235_v58 = vrot.slane %v234_v57, 2 }
 0x297   :  { %v236_v59 = vadd.f32 %v235_v58, %v234_v57 }
 0x299   :  { %v237_v60 = vrot.slane %v236_v59, 1 }
 0x29b   :  { %v238_v61 = vadd.f32 %v237_v60, %v236_v59 }
 0x29d   :  { %v239_v62 = vmul.f32 0.125, %v238_v61 }
 0x29f   :  { %v240_v63 = vsub.f32 %v224_v51, %v239_v62 }
 0x2a1   :  { %v241_v1 = vmul.f32 %v240_v63, %v240_v63 }
 0x2a3   :  { %v242_v2 = vsel %vm49_vm1, %v241_v1, 0.0 }
 0x2a4   :  { %v243_v3 = vrot.slane %v242_v2, 4 }
 0x2a6   :  { %v244_v4 = vadd.f32 %v243_v3, %v242_v2 }
 0x2a8   :  { %v245_v5 = vrot.slane %v244_v4, 2 }
 0x2aa   :  { %v246_v6 = vadd.f32 %v245_v5, %v244_v4 }
 0x2ac   :  { %v247_v7 = vrot.slane %v246_v6, 1 }
 0x2ae   :  { %v248_v8 = vadd.f32 %v247_v7, %v246_v6 }
 0x2b0   :  { %v249_v9 = vmul.f32 0.125, %v248_v8 }
 0x2b2   :  { %v250_v10 = vadd.f32 1e-05, %v249_v9 }
 0x2b4   :  { %477 = vrsqrt.f32 %v250_v10 }
 0x2be   :  { %v478_v13 = vpop.eup %477 }
 0x2bf   :  { %v252_v15 = vmul.f32 %v478_v13, %v230_v11 }
 0x2c1   :  { %v256_v16 = vrot.slane %v252_v15, %v137_v35 }
 0x2c3   :  { %v257_v18 = vmul.f32 %v256_v16, %v240_v63 }
 0x2c5   :  { %v262_v19 = vadd.f32 %v395_v17, %v257_v18 }
 0x2c7   :  { %v263_v20 = vmax.f32 %v262_v19, 0.0 }
 0x2c9   :  { %265 = vrot.lane.b32.xlu0 %v263_v20, %s552_s28 }
 0x33b   :  { %v266_v21 = vpop.permute.xlu0 %265 }
 0x33c   :  { %269 = vst.msk [vmem:[#allocation2] sm:$0xff] %vm268_vm4, %v266_v21 }
 0x343   :  { %v270_v22 = vld [vmem:[#allocation2] sm:$0xff] }
 0x344   :  { %v271_v23 = vpack.c.bf16 %v270_v22, %v270_v22 }
 0x346   :  { %452 = vmatmul.mubr.msk.bf16.vlgmr.msra.gmra.mrb[0].mxu0 %vm325_vm5, %v271_v23 }
 0x419   :  { %v363_v0 = vpop.f32.mrb[0].mxu0 }
 0x41a   :  { %v364_v25 = vadd.f32 %v396_v24, %v363_v0  ;;  %v453_v26 = vpop.f32.mrb[1].mxu0 }
 0x41b   :  { %v366_v27 = vpop.f32.mrb[2].mxu0 }
 0x41c   :  { %369 = vst [vmem:[#allocation8] sm:$0xff] %v364_v25  ;;  %v454_v28 = vpop.f32.mrb[3].mxu0 }
 0x41d   :  { %534 = shalt.err (!%p531_p6)
}
 0x41e   :  { %s535_s1 = scalar_lea.hbm %s697_s5, 128 }
 0x41f   :  { %p536_p7 = scmp.ne.s32.totalorder %s697_s5, %s535_s1  ;;  %p539_p8 = scmp.lt.u32.totalorder %s535_s1, %s697_s5 }
 0x421   :  { %p541_p9 = pnand %p539_p8, %p536_p7 }
 0x423   :  { %544 = shalt.err (!%p541_p9)
}
 0x424   :  { %379 = dma.vmem_to_hbm [thread:$0]  %s377_s14, 128, %s697_s5, [#allocation5]  }
 0x425   :  { %549 = dma.done.wait [#allocation5], 128  }
 0x426   :  { %550 = vsyncadd [#allocation5], 4294967168 }
 0x427   :  { %383 = vsyncpa [#allocation4], 1 }
 0x428   :  { %384 = vsyncpa [#allocation7], 1 }
 0x429   :  { %385 = vsyncpa [#allocation5], 1 }

</bundles_post_ra>
